<compile_context>
chip_gen: v7x
topology: tpu7x:2x2x1
jax: 0.10.0
libtpu: 0.0.40
codegen_flags: <defaults>
</compile_context>

<pallas_src>
import functools
import math

import jax
import jax.numpy as jnp
from jax.experimental import pallas as pl
from jax.experimental.pallas import tpu as pltpu

_LANE = 128
_VMEM_BUDGET = 36 * 1024 * 1024   # target tile footprint (fits v7x 64 MiB VMEM)
_VMEM_LIMIT_CAP = 48 * 1024 * 1024
_VMEM_LIMIT_LOSS = 32 * 1024 * 1024


def _round_up(x, m):
    return ((x + m - 1) // m) * m


def _pick_tiles(m, k, n, out_itemsize):
    """Row tile (parallel axis) and contraction tile for C = A(m,k) @ B(k,n)."""
    # Prefer >= 2 row tiles so the "parallel" axis can shard across v7x's two
    # TensorCores (no-op on v5e/v6e); keep MXU-friendly multiples of 128.
    tm = m
    for t in (512, 384, 256, 128):
        if m % t == 0 and m // t >= 2:
            tm = t
            break
    # Contraction tile: biggest that fits the VMEM budget (A is the dominant
    # stream; large tk amortizes per-grid-step overhead).
    tk = 128
    for t in (4096, 2048, 1024, 512, 256, 128):
        if k % t != 0:
            continue
        footprint = (2 * tm * t * 2          # A tiles, double-buffered, bf16
                     + 2 * t * n * 2         # B tiles, double-buffered, bf16
                     + 2 * tm * n * out_itemsize   # output tiles
                     + tm * n * 4)           # f32 accumulator scratch
        if footprint <= _VMEM_BUDGET:
            tk = t
            break
    return tm, tk


# ----------------------------------------------------------------------------
# Kernel 1: generic tiled  C = act(A @ B)  with f32 VMEM accumulator.
#   grid = (row tiles ["parallel"], contraction tiles ["arbitrary"]).
#   Used twice per GCN layer: once for the small X@W (or AX@W) product and
#   once for the O(n^2) A-product — no redundant recompute across row tiles.
# ----------------------------------------------------------------------------
def _matmul_act_kernel(a_ref, b_ref, o_ref, acc_ref, *, apply_act):
    k = pl.program_id(1)

    @pl.when(k == 0)
    def _init():
        acc_ref[...] = jnp.zeros_like(acc_ref)

    acc_ref[...] += jnp.dot(a_ref[...], b_ref[...],
                            preferred_element_type=jnp.float32)

    @pl.when(k == pl.num_programs(1) - 1)
    def _finalize():
        h = acc_ref[...]
        if apply_act:
            h = jnp.maximum(h, 0.0)
        o_ref[...] = h.astype(o_ref.dtype)   # bf16 writeback: halves HBM bytes


def matmul_act(a, b, *, apply_act=False, out_dtype=jnp.bfloat16):
    m, k = a.shape
    k2, n = b.shape
    assert k == k2
    out_itemsize = jnp.dtype(out_dtype).itemsize
    tm, tk = _pick_tiles(m, k, n, out_itemsize)
    grid = (m // tm, k // tk)

    footprint = (2 * tm * tk * a.dtype.itemsize + 2 * tk * n * b.dtype.itemsize
                 + 2 * tm * n * out_itemsize + tm * n * 4)
    vmem_limit = int(min(max(footprint + (4 << 20), 16 << 20), _VMEM_LIMIT_CAP))

    return pl.pallas_call(
        functools.partial(_matmul_act_kernel, apply_act=apply_act),
        out_shape=jax.ShapeDtypeStruct((m, n), out_dtype),
        grid_spec=pltpu.PrefetchScalarGridSpec(
            num_scalar_prefetch=0,
            grid=grid,
            in_specs=[
                pl.BlockSpec((tm, tk), lambda i, kk: (i, kk)),
                pl.BlockSpec((tk, n), lambda i, kk: (kk, 0)),
            ],
            out_specs=pl.BlockSpec((tm, n), lambda i, kk: (i, 0)),
            scratch_shapes=[pltpu.VMEM((tm, n), jnp.float32)],
        ),
        compiler_params=pltpu.CompilerParams(
            dimension_semantics=("parallel", "arbitrary"),
            vmem_limit_bytes=vmem_limit,
        ),
        cost_estimate=pl.CostEstimate(
            flops=2 * m * k * n,
            transcendentals=0,
            bytes_accessed=(m * k * a.dtype.itemsize + k * n * b.dtype.itemsize
                            + m * n * out_itemsize)),
    )(a, b)


def gcn_layer(a_norm, x, w, apply_act):
    """h = act(A_norm @ x @ w), all operands bf16 padded to multiples of 128."""
    fin, fout = w.shape
    if fout <= fin:
        # Hoist X@W (cheap) out of the O(n^2) sweep; stream only A and XW.
        xw = matmul_act(x, w, apply_act=False)
        return matmul_act(a_norm, xw, apply_act=apply_act)
    # fin < fout: stream the narrower X on the O(n^2) term, then apply W.
    ax = matmul_act(a_norm, x, apply_act=False)
    return matmul_act(ax, w, apply_act=apply_act)


# ----------------------------------------------------------------------------
# Kernel 2: inner-product edge scores + NCE loss.
#   Edge embeddings arrive transposed as (d, edges) bf16 blocks so the
#   d-reduction leaves a lane-dense (1, te) score row: the logsigmoid epilogue
#   (exp/log1p/where) uses all 128 lanes.  Scalar accumulation in SMEM across
#   edge tiles ("arbitrary"); padded edges masked out exactly.
# ----------------------------------------------------------------------------
def _nce_loss_kernel(counts_ref, zps_ref, zpd_ref, zns_ref, znd_ref, o_ref,
                     acc_ref, *, te_pos, te_neg):
    i = pl.program_id(0)

    @pl.when(i == 0)
    def _init():
        acc_ref[0] = jnp.float32(0.0)

    def logsigmoid(x):
        # numerically stable log(sigmoid(x))
        return jnp.minimum(x, 0.0) - jnp.log1p(jnp.exp(-jnp.abs(x)))

    n_pos = counts_ref[0]
    n_neg = counts_ref[1]

    # inner-product decoder scores: f32 multiply-reduce over the feature dim.
    pos_score = jnp.sum(zps_ref[...].astype(jnp.float32)
                        * zpd_ref[...].astype(jnp.float32),
                        axis=0, keepdims=True)                 # (1, te_pos)
    neg_score = jnp.sum(zns_ref[...].astype(jnp.float32)
                        * znd_ref[...].astype(jnp.float32),
                        axis=0, keepdims=True)                 # (1, te_neg)

    # mask padded edges (logsigmoid(0) != 0, so padding would bias the loss)
    col_p = jax.lax.broadcasted_iota(jnp.int32, (1, te_pos), 1) + i * te_pos
    col_n = jax.lax.broadcasted_iota(jnp.int32, (1, te_neg), 1) + i * te_neg
    pos_ls = jnp.where(col_p < n_pos, logsigmoid(pos_score), 0.0)
    neg_ls = jnp.where(col_n < n_neg, logsigmoid(-neg_score), 0.0)

    # mean over positive edges = (sum of per-edge losses) / n_pos; summing the
    # negatives directly avoids any (E*K)->(E,K) reshape / ordering assumption.
    acc_ref[0] += -jnp.sum(pos_ls) - jnp.sum(neg_ls)

    @pl.when(i == pl.num_programs(0) - 1)
    def _finalize():
        denom = jnp.maximum(n_pos, 1).astype(jnp.float32)   # guard n_pos == 0
        o_ref[0] = acc_ref[0] / denom


def nce_loss(z, pos_src, pos_dst, neg_src, neg_dst, neg_k, *, te=1024):
    d = z.shape[1]
    n_pos = int(pos_src.shape[0])
    n_neg = int(neg_src.shape[0])

    # edge tile: big (amortize per-step overhead) but capped so the 4 double-
    # buffered (d, te) bf16 blocks stay well inside VMEM on every generation.
    max_te = max(_LANE,
                 (24 * 1024 * 1024) // (8 * d * (1 + neg_k)) // _LANE * _LANE)
    te_pos = min(te, max_te, _round_up(n_pos, _LANE))
    n_pos_pad = _round_up(n_pos, te_pos)
    n_tiles = n_pos_pad // te_pos
    te_neg = te_pos * neg_k
    n_neg_pad = n_tiles * te_neg
    assert n_neg <= n_neg_pad

    def gather_t(idx, cols):
        # (d, cols) bf16, zero-padded columns.
        # TODO(synk): fuse this gather into the kernel (scalar-prefetch row
        # indices + in-kernel DMA from z kept in pl.ANY) to avoid materializing
        # the gathered arrays in HBM.
        g = jnp.take(z, idx, axis=0).T
        return jnp.zeros((d, cols), z.dtype).at[:, :idx.shape[0]].set(g)

    zps = gather_t(pos_src, n_pos_pad)
    zpd = gather_t(pos_dst, n_pos_pad)
    zns = gather_t(neg_src, n_neg_pad)
    znd = gather_t(neg_dst, n_neg_pad)
    counts = jnp.array([n_pos, n_neg], jnp.int32)

    out = pl.pallas_call(
        functools.partial(_nce_loss_kernel, te_pos=te_pos, te_neg=te_neg),
        out_shape=jax.ShapeDtypeStruct((1,), jnp.float32),
        grid_spec=pltpu.PrefetchScalarGridSpec(
            num_scalar_prefetch=1,           # counts -> SMEM
            grid=(n_tiles,),
            in_specs=[
                pl.BlockSpec((d, te_pos), lambda i, c: (0, i)),
                pl.BlockSpec((d, te_pos), lambda i, c: (0, i)),
                pl.BlockSpec((d, te_neg), lambda i, c: (0, i)),
                pl.BlockSpec((d, te_neg), lambda i, c: (0, i)),
            ],
            out_specs=pl.BlockSpec(memory_space=pltpu.MemorySpace.SMEM),
            scratch_shapes=[pltpu.SMEM((1,), jnp.float32)],
        ),
        compiler_params=pltpu.CompilerParams(
            dimension_semantics=("arbitrary",),
            vmem_limit_bytes=_VMEM_LIMIT_LOSS,
        ),
        cost_estimate=pl.CostEstimate(
            flops=3 * (n_pos_pad + n_neg_pad) * d,
            transcendentals=2 * (n_pos_pad + n_neg_pad),
            bytes_accessed=2 * (n_pos_pad + n_neg_pad) * d * 2 + 4),
    )(counts, zps, zpd, zns, znd)
    return out[0]


# ----------------------------------------------------------------------------
# GAE forward (wrapper / glue): pad to lane-dense shapes, bf16 MXU inputs.
# ----------------------------------------------------------------------------
def gae_forward(a_norm, features, weights, pos_src, pos_dst, neg_src, neg_dst,
                neg_sample_size=1):
    n = a_norm.shape[0]
    n_pad = _round_up(n, _LANE)

    a_p = jnp.zeros((n_pad, n_pad), jnp.bfloat16).at[:n, :n].set(
        a_norm.astype(jnp.bfloat16))

    d_in = features.shape[1]
    d_in_p = _round_up(d_in, _LANE)
    h = jnp.zeros((n_pad, d_in_p), jnp.bfloat16).at[:n, :d_in].set(
        features.astype(jnp.bfloat16))

    for i, w in enumerate(weights):
        fin, fout = w.shape
        fin_p, fout_p = _round_up(fin, _LANE), _round_up(fout, _LANE)
        w_p = jnp.zeros((fin_p, fout_p), jnp.bfloat16).at[:fin, :fout].set(
            w.astype(jnp.bfloat16))
        # activations stay bf16 end-to-end (kernels emit bf16 directly)
        h = gcn_layer(a_p, h, w_p, apply_act=(i < len(weights) - 1))

    # z == h (bf16): padded feature columns are exactly zero, so inner-product
    # scores over the padded dim are unchanged.
    return nce_loss(h, pos_src, pos_dst, neg_src, neg_dst, neg_sample_size)


# ----------------------------------------------------------------------------
# Deterministic setup
# ----------------------------------------------------------------------------
def build_graph(n_nodes):
    # ring graph, directed edges both ways
    src = jnp.concatenate([jnp.arange(n_nodes), (jnp.arange(n_nodes) + 1) % n_nodes])
    dst = jnp.concatenate([(jnp.arange(n_nodes) + 1) % n_nodes, jnp.arange(n_nodes)])
    adj = jnp.zeros((n_nodes, n_nodes), jnp.float32).at[src, dst].set(1.0)
    return adj, src, dst


def normalize_adj(adj):
    # symmetric normalization with self-loops: D^{-1/2} (A + I) D^{-1/2}
    a_hat = adj + jnp.eye(adj.shape[0], dtype=adj.dtype)
    deg = jnp.sum(a_hat, axis=1)
    d_inv_sqrt = 1.0 / jnp.sqrt(deg)
    return a_hat * d_inv_sqrt[:, None] * d_inv_sqrt[None, :]


def xavier_init(key, fan_in, fan_out):
    limit = math.sqrt(6.0 / (fan_in + fan_out))
    return jax.random.uniform(key, (fan_in, fan_out), jnp.float32, -limit, limit)


if __name__ == "__main__":
    key = jax.random.PRNGKey(0)

    n_nodes = 16
    in_feats = 8
    hidden_dims = [32, 16]
    neg_sample_size = 1

    adj, pos_src, pos_dst = build_graph(n_nodes)
    a_norm = normalize_adj(adj)

    k_feat, k_w0, k_w1, k_neg = jax.random.split(key, 4)
    features = jax.random.normal(k_feat, (n_nodes, in_feats), jnp.float32)

    weights = [
        xavier_init(k_w0, in_feats, hidden_dims[0]),
        xavier_init(k_w1, hidden_dims[0], hidden_dims[1]),
    ]

    # deterministic negative sampling: keep source, corrupt destination
    n_edges = pos_src.shape[0]
    neg_src = jnp.repeat(pos_src, neg_sample_size)
    neg_dst = jax.random.randint(k_neg, (n_edges * neg_sample_size,), 0, n_nodes)

    fwd = jax.jit(gae_forward, static_argnames=("neg_sample_size",))
    loss = fwd(a_norm, features, weights, pos_src, pos_dst,
               neg_src, neg_dst, neg_sample_size=neg_sample_size)
    loss = jax.block_until_ready(loss)

    assert loss.shape == () and jnp.isfinite(loss)
    print("KERNEL_OK")
</pallas_src>

<mosaic_0001>
module attributes {stable_mosaic.version = 11 : i64} {
  func.func @_matmul_act_kernel(%arg0: i32, %arg1: i32, %arg2: memref<128x128xbf16, #tpu.memory_space<vmem>>, %arg3: memref<128x128xbf16, #tpu.memory_space<vmem>>, %arg4: memref<128x128xbf16, #tpu.memory_space<vmem>>, %arg5: memref<128x128xf32, #tpu.memory_space<vmem>>) attributes {dimension_semantics = [#tpu.dimension_semantics<parallel>, #tpu.dimension_semantics<arbitrary>], iteration_bounds = array<i64: 1, 1>, scalar_prefetch = 0 : i64, scratch_operands = 1 : i64, tpu.core_type = #tpu.core_type<tc>, window_params = [{transform_indices = @transform_0, window_bounds = array<i64: 128, 128>}, {transform_indices = @transform_1, window_bounds = array<i64: 128, 128>}, {transform_indices = @transform_2, window_bounds = array<i64: 128, 128>}]} {
    %c0_i32 = arith.constant 0 : i32
    %0 = arith.cmpi eq, %arg1, %c0_i32 : i32
    %1 = arith.extui %0 : i1 to i32
    %c0_i32_0 = arith.constant 0 : i32
    %2 = arith.cmpi ne, %1, %c0_i32_0 : i32
    scf.if %2 {
      %cst_10 = arith.constant 0.000000e+00 : f32
      %12 = vector.broadcast %cst_10 : f32 to vector<128x128xf32>
      %c0_11 = arith.constant 0 : index
      %c0_12 = arith.constant 0 : index
      %13 = vector.load %arg5[%c0_11, %c0_12] : memref<128x128xf32, #tpu.memory_space<vmem>>, vector<128x128xf32>
      tpu.vector_store %arg5[%c0_11, %c0_12], %12 {strides = array<i32>} : memref<128x128xf32, #tpu.memory_space<vmem>>, vector<128x128xf32>,
    } else {
    }
    %c0 = arith.constant 0 : index
    %c0_1 = arith.constant 0 : index
    %3 = vector.load %arg5[%c0, %c0_1] : memref<128x128xf32, #tpu.memory_space<vmem>>, vector<128x128xf32>
    %c0_2 = arith.constant 0 : index
    %c0_3 = arith.constant 0 : index
    %4 = vector.load %arg2[%c0_2, %c0_3] : memref<128x128xbf16, #tpu.memory_space<vmem>>, vector<128x128xbf16>
    %c0_4 = arith.constant 0 : index
    %c0_5 = arith.constant 0 : index
    %5 = vector.load %arg3[%c0_4, %c0_5] : memref<128x128xbf16, #tpu.memory_space<vmem>>, vector<128x128xbf16>
    %cst = arith.constant dense<0.000000e+00> : vector<128x128xf32>
    %6 = tpu.matmul %4, %5, %cst {dimension_numbers = #tpu.dot_dimension_numbers<[1], [0], [0], [1], [0, 0, 1, 1], [], []>} : vector<128x128xbf16>, vector<128x128xbf16>, vector<128x128xf32> -> vector<128x128xf32>
    %7 = arith.addf %3, %6 : vector<128x128xf32>
    %c0_6 = arith.constant 0 : index
    %c0_7 = arith.constant 0 : index
    %8 = vector.load %arg5[%c0_6, %c0_7] : memref<128x128xf32, #tpu.memory_space<vmem>>, vector<128x128xf32>
    tpu.vector_store %arg5[%c0_6, %c0_7], %7 {strides = array<i32>} : memref<128x128xf32, #tpu.memory_space<vmem>>, vector<128x128xf32>,
    %c0_i32_8 = arith.constant 0 : i32
    %9 = arith.cmpi eq, %arg1, %c0_i32_8 : i32
    %10 = arith.extui %9 : i1 to i32
    %c0_i32_9 = arith.constant 0 : i32
    %11 = arith.cmpi ne, %10, %c0_i32_9 : i32
    scf.if %11 {
      %c0_10 = arith.constant 0 : index
      %c0_11 = arith.constant 0 : index
      %12 = vector.load %arg5[%c0_10, %c0_11] : memref<128x128xf32, #tpu.memory_space<vmem>>, vector<128x128xf32>
      %13 = arith.truncf %12 : vector<128x128xf32> to vector<128x128xbf16>
      %c0_12 = arith.constant 0 : index
      %c0_13 = arith.constant 0 : index
      %14 = vector.load %arg4[%c0_12, %c0_13] : memref<128x128xbf16, #tpu.memory_space<vmem>>, vector<128x128xbf16>
      tpu.vector_store %arg4[%c0_12, %c0_13], %13 {strides = array<i32>} : memref<128x128xbf16, #tpu.memory_space<vmem>>, vector<128x128xbf16>,
    } else {
    }
    return
  }
  func.func @transform_0(%arg0: i32, %arg1: i32) -> (i32, i32) {
    %c0_i32 = arith.constant 0 : i32
    return %arg0, %arg1 : i32, i32
  }
  func.func @transform_1(%arg0: i32, %arg1: i32) -> (i32, i32) {
    %c0_i32 = arith.constant 0 : i32
    %c0_i32_0 = arith.constant 0 : i32
    return %arg1, %c0_i32 : i32, i32
  }
  func.func @transform_2(%arg0: i32, %arg1: i32) -> (i32, i32) {
    %c0_i32 = arith.constant 0 : i32
    %c0_i32_0 = arith.constant 0 : i32
    return %arg0, %c0_i32 : i32, i32
  }
}

module attributes {stable_mosaic.version = 11 : i64} {
  func.func @_matmul_act_kernel(%arg0: i32, %arg1: i32, %arg2: memref<128x128xbf16, #tpu.memory_space<vmem>>, %arg3: memref<128x128xbf16, #tpu.memory_space<vmem>>, %arg4: memref<128x128xbf16, #tpu.memory_space<vmem>>, %arg5: memref<128x128xf32, #tpu.memory_space<vmem>>) attributes {dimension_semantics = [#tpu.dimension_semantics<parallel>, #tpu.dimension_semantics<arbitrary>], iteration_bounds = array<i64: 1, 1>, scalar_prefetch = 0 : i64, scratch_operands = 1 : i64, tpu.core_type = #tpu.core_type<tc>, window_params = [{transform_indices = @transform_0, window_bounds = array<i64: 128, 128>}, {transform_indices = @transform_1, window_bounds = array<i64: 128, 128>}, {transform_indices = @transform_2, window_bounds = array<i64: 128, 128>}]} {
    %c0_i32 = arith.constant 0 : i32
    %0 = arith.cmpi eq, %arg1, %c0_i32 : i32
    %1 = arith.extui %0 : i1 to i32
    %c0_i32_0 = arith.constant 0 : i32
    %2 = arith.cmpi ne, %1, %c0_i32_0 : i32
    scf.if %2 {
      %cst_10 = arith.constant 0.000000e+00 : f32
      %12 = vector.broadcast %cst_10 : f32 to vector<128x128xf32>
      %c0_11 = arith.constant 0 : index
      %c0_12 = arith.constant 0 : index
      %13 = vector.load %arg5[%c0_11, %c0_12] : memref<128x128xf32, #tpu.memory_space<vmem>>, vector<128x128xf32>
      tpu.vector_store %arg5[%c0_11, %c0_12], %12 {strides = array<i32>} : memref<128x128xf32, #tpu.memory_space<vmem>>, vector<128x128xf32>,
    } else {
    }
    %c0 = arith.constant 0 : index
    %c0_1 = arith.constant 0 : index
    %3 = vector.load %arg5[%c0, %c0_1] : memref<128x128xf32, #tpu.memory_space<vmem>>, vector<128x128xf32>
    %c0_2 = arith.constant 0 : index
    %c0_3 = arith.constant 0 : index
    %4 = vector.load %arg2[%c0_2, %c0_3] : memref<128x128xbf16, #tpu.memory_space<vmem>>, vector<128x128xbf16>
    %c0_4 = arith.constant 0 : index
    %c0_5 = arith.constant 0 : index
    %5 = vector.load %arg3[%c0_4, %c0_5] : memref<128x128xbf16, #tpu.memory_space<vmem>>, vector<128x128xbf16>
    %cst = arith.constant dense<0.000000e+00> : vector<128x128xf32>
    %6 = tpu.matmul %4, %5, %cst {dimension_numbers = #tpu.dot_dimension_numbers<[1], [0], [0], [1], [0, 0, 1, 1], [], []>} : vector<128x128xbf16>, vector<128x128xbf16>, vector<128x128xf32> -> vector<128x128xf32>
    %7 = arith.addf %3, %6 : vector<128x128xf32>
    %c0_6 = arith.constant 0 : index
    %c0_7 = arith.constant 0 : index
    %8 = vector.load %arg5[%c0_6, %c0_7] : memref<128x128xf32, #tpu.memory_space<vmem>>, vector<128x128xf32>
    tpu.vector_store %arg5[%c0_6, %c0_7], %7 {strides = array<i32>} : memref<128x128xf32, #tpu.memory_space<vmem>>, vector<128x128xf32>,
    %c0_i32_8 = arith.constant 0 : i32
    %9 = arith.cmpi eq, %arg1, %c0_i32_8 : i32
    %10 = arith.extui %9 : i1 to i32
    %c0_i32_9 = arith.constant 0 : i32
    %11 = arith.cmpi ne, %10, %c0_i32_9 : i32
    scf.if %11 {
      %c0_10 = arith.constant 0 : index
      %c0_11 = arith.constant 0 : index
      %12 = vector.load %arg5[%c0_10, %c0_11] : memref<128x128xf32, #tpu.memory_space<vmem>>, vector<128x128xf32>
      %cst_12 = arith.constant 0.000000e+00 : f32
      %13 = vector.broadcast %cst_12 : f32 to vector<128x128xf32>
      %14 = arith.maximumf %12, %13 : vector<128x128xf32>
      %15 = arith.truncf %14 : vector<128x128xf32> to vector<128x128xbf16>
      %c0_13 = arith.constant 0 : index
      %c0_14 = arith.constant 0 : index
      %16 = vector.load %arg4[%c0_13, %c0_14] : memref<128x128xbf16, #tpu.memory_space<vmem>>, vector<128x128xbf16>
      tpu.vector_store %arg4[%c0_13, %c0_14], %15 {strides = array<i32>} : memref<128x128xbf16, #tpu.memory_space<vmem>>, vector<128x128xbf16>,
    } else {
    }
    return
  }
  func.func @transform_0(%arg0: i32, %arg1: i32) -> (i32, i32) {
    %c0_i32 = arith.constant 0 : i32
    return %arg0, %arg1 : i32, i32
  }
  func.func @transform_1(%arg0: i32, %arg1: i32) -> (i32, i32) {
    %c0_i32 = arith.constant 0 : i32
    %c0_i32_0 = arith.constant 0 : i32
    return %arg1, %c0_i32 : i32, i32
  }
  func.func @transform_2(%arg0: i32, %arg1: i32) -> (i32, i32) {
    %c0_i32 = arith.constant 0 : i32
    %c0_i32_0 = arith.constant 0 : i32
    return %arg0, %c0_i32 : i32, i32
  }
}

module attributes {stable_mosaic.version = 11 : i64} {
  func.func @_nce_loss_kernel(%arg0: i32, %arg1: memref<2xi32, #tpu.memory_space<smem>>, %arg2: memref<128x128xbf16, #tpu.memory_space<vmem>>, %arg3: memref<128x128xbf16, #tpu.memory_space<vmem>>, %arg4: memref<128x128xbf16, #tpu.memory_space<vmem>>, %arg5: memref<128x128xbf16, #tpu.memory_space<vmem>>, %arg6: memref<1xf32, #tpu.memory_space<smem>>, %arg7: memref<1xf32, #tpu.memory_space<smem>>) attributes {dimension_semantics = [#tpu.dimension_semantics<arbitrary>], iteration_bounds = array<i64: 1>, scalar_prefetch = 1 : i64, scratch_operands = 1 : i64, tpu.core_type = #tpu.core_type<tc>, window_params = [{transform_indices = @transform_0, window_bounds = array<i64: 128, 128>}, {transform_indices = @transform_1, window_bounds = array<i64: 128, 128>}, {transform_indices = @transform_2, window_bounds = array<i64: 128, 128>}, {transform_indices = @transform_3, window_bounds = array<i64: 128, 128>}, {transform_indices = @transform_4, window_bounds = array<i64: 1>}]} {
    %c0_i32 = arith.constant 0 : i32
    %0 = arith.cmpi eq, %arg0, %c0_i32 : i32
    %1 = arith.extui %0 : i1 to i32
    %c0_i32_0 = arith.constant 0 : i32
    %2 = arith.cmpi ne, %1, %c0_i32_0 : i32
    scf.if %2 {
      %cst_25 = arith.constant 0.000000e+00 : f32
      %c0_26 = arith.constant 0 : index
      %69 = memref.load %arg7[%c0_26] : memref<1xf32, #tpu.memory_space<smem>>
      memref.store %cst_25, %arg7[%c0_26] : memref<1xf32, #tpu.memory_space<smem>>
    } else {
    }
    %c0 = arith.constant 0 : index
    %3 = memref.load %arg1[%c0] : memref<2xi32, #tpu.memory_space<smem>>
    %c1 = arith.constant 1 : index
    %4 = memref.load %arg1[%c1] : memref<2xi32, #tpu.memory_space<smem>>
    %c0_1 = arith.constant 0 : index
    %c0_2 = arith.constant 0 : index
    %5 = vector.load %arg2[%c0_1, %c0_2] : memref<128x128xbf16, #tpu.memory_space<vmem>>, vector<128x128xbf16>
    %6 = arith.extf %5 : vector<128x128xbf16> to vector<128x128xf32>
    %c0_3 = arith.constant 0 : index
    %c0_4 = arith.constant 0 : index
    %7 = vector.load %arg3[%c0_3, %c0_4] : memref<128x128xbf16, #tpu.memory_space<vmem>>, vector<128x128xbf16>
    %8 = arith.extf %7 : vector<128x128xbf16> to vector<128x128xf32>
    %9 = arith.mulf %6, %8 : vector<128x128xf32>
    %cst = arith.constant dense<0.000000e+00> : vector<128xf32>
    %10 = vector.multi_reduction <add>, %9, %cst [0] : vector<128x128xf32> to vector<128xf32>
    %11 = vector.shape_cast %10 : vector<128xf32> to vector<1x128xf32>
    %c0_5 = arith.constant 0 : index
    %c0_6 = arith.constant 0 : index
    %12 = vector.load %arg4[%c0_5, %c0_6] : memref<128x128xbf16, #tpu.memory_space<vmem>>, vector<128x128xbf16>
    %13 = arith.extf %12 : vector<128x128xbf16> to vector<128x128xf32>
    %c0_7 = arith.constant 0 : index
    %c0_8 = arith.constant 0 : index
    %14 = vector.load %arg5[%c0_7, %c0_8] : memref<128x128xbf16, #tpu.memory_space<vmem>>, vector<128x128xbf16>
    %15 = arith.extf %14 : vector<128x128xbf16> to vector<128x128xf32>
    %16 = arith.mulf %13, %15 : vector<128x128xf32>
    %cst_9 = arith.constant dense<0.000000e+00> : vector<128xf32>
    %17 = vector.multi_reduction <add>, %16, %cst_9 [0] : vector<128x128xf32> to vector<128xf32>
    %18 = vector.shape_cast %17 : vector<128xf32> to vector<1x128xf32>
    %19 = tpu.iota {dimensions = array<i32: 1>} : vector<1x128xi32>
    %c128_i32 = arith.constant 128 : i32
    %20 = arith.muli %arg0, %c128_i32 : i32
    %21 = vector.broadcast %20 : i32 to vector<1x128xi32>
    %22 = arith.addi %19, %21 : vector<1x128xi32>
    %23 = tpu.iota {dimensions = array<i32: 1>} : vector<1x128xi32>
    %c128_i32_10 = arith.constant 128 : i32
    %24 = arith.muli %arg0, %c128_i32_10 : i32
    %25 = vector.broadcast %24 : i32 to vector<1x128xi32>
    %26 = arith.addi %23, %25 : vector<1x128xi32>
    %27 = vector.broadcast %3 : i32 to vector<1x128xi32>
    %28 = arith.cmpi slt, %22, %27 : vector<1x128xi32>
    %cst_11 = arith.constant 0.000000e+00 : f32
    %29 = vector.broadcast %cst_11 : f32 to vector<1x128xf32>
    %30 = arith.minimumf %11, %29 : vector<1x128xf32>
    %31 = math.absf %11 : vector<1x128xf32>
    %cst_12 = arith.constant 0.000000e+00 : f32
    %32 = vector.broadcast %cst_12 : f32 to vector<1x128xf32>
    %33 = arith.subf %32, %31 : vector<1x128xf32>
    %34 = math.exp %33 : vector<1x128xf32>
    %35 = math.log1p %34 : vector<1x128xf32>
    %36 = arith.subf %30, %35 : vector<1x128xf32>
    %cst_13 = arith.constant 0.000000e+00 : f32
    %37 = vector.broadcast %cst_13 : f32 to vector<1x128xf32>
    %38 = arith.select %28, %36, %37 : vector<1x128xi1>, vector<1x128xf32>
    %39 = vector.broadcast %4 : i32 to vector<1x128xi32>
    %40 = arith.cmpi slt, %26, %39 : vector<1x128xi32>
    %cst_14 = arith.constant 0.000000e+00 : f32
    %41 = vector.broadcast %cst_14 : f32 to vector<1x128xf32>
    %42 = arith.subf %41, %18 : vector<1x128xf32>
    %cst_15 = arith.constant 0.000000e+00 : f32
    %43 = vector.broadcast %cst_15 : f32 to vector<1x128xf32>
    %44 = arith.minimumf %42, %43 : vector<1x128xf32>
    %45 = math.absf %42 : vector<1x128xf32>
    %cst_16 = arith.constant 0.000000e+00 : f32
    %46 = vector.broadcast %cst_16 : f32 to vector<1x128xf32>
    %47 = arith.subf %46, %45 : vector<1x128xf32>
    %48 = math.exp %47 : vector<1x128xf32>
    %49 = math.log1p %48 : vector<1x128xf32>
    %50 = arith.subf %44, %49 : vector<1x128xf32>
    %cst_17 = arith.constant 0.000000e+00 : f32
    %51 = vector.broadcast %cst_17 : f32 to vector<1x128xf32>
    %52 = arith.select %40, %50, %51 : vector<1x128xi1>, vector<1x128xf32>
    %c0_18 = arith.constant 0 : index
    %53 = memref.load %arg7[%c0_18] : memref<1xf32, #tpu.memory_space<smem>>
    %54 = vector.shape_cast %38 : vector<1x128xf32> to vector<1x1x128xf32>
    %cst_19 = arith.constant dense<0.000000e+00> : vector<1xf32>
    %55 = vector.multi_reduction <add>, %54, %cst_19 [1, 2] : vector<1x1x128xf32> to vector<1xf32>
    %56 = vector.shape_cast %55 : vector<1xf32> to vector<1x1x1xf32>
    %57 = vector.extract %56[0, 0, 0] : f32 from vector<1x1x1xf32>
    %cst_20 = arith.constant 0.000000e+00 : f32
    %58 = arith.subf %cst_20, %57 : f32
    %59 = vector.shape_cast %52 : vector<1x128xf32> to vector<1x1x128xf32>
    %cst_21 = arith.constant dense<0.000000e+00> : vector<1xf32>
    %60 = vector.multi_reduction <add>, %59, %cst_21 [1, 2] : vector<1x1x128xf32> to vector<1xf32>
    %61 = vector.shape_cast %60 : vector<1xf32> to vector<1x1x1xf32>
    %62 = vector.extract %61[0, 0, 0] : f32 from vector<1x1x1xf32>
    %63 = arith.subf %58, %62 : f32
    %64 = arith.addf %53, %63 : f32
    %c0_22 = arith.constant 0 : index
    %65 = memref.load %arg7[%c0_22] : memref<1xf32, #tpu.memory_space<smem>>
    memref.store %64, %arg7[%c0_22] : memref<1xf32, #tpu.memory_space<smem>>
    %c0_i32_23 = arith.constant 0 : i32
    %66 = arith.cmpi eq, %arg0, %c0_i32_23 : i32
    %67 = arith.extui %66 : i1 to i32
    %c0_i32_24 = arith.constant 0 : i32
    %68 = arith.cmpi ne, %67, %c0_i32_24 : i32
    scf.if %68 {
      %c1_i32 = arith.constant 1 : i32
      %69 = arith.maxsi %3, %c1_i32 : i32
      %70 = arith.sitofp %69 : i32 to f32
      %c0_25 = arith.constant 0 : index
      %71 = memref.load %arg7[%c0_25] : memref<1xf32, #tpu.memory_space<smem>>
      %72 = arith.divf %71, %70 : f32
      %c0_26 = arith.constant 0 : index
      %73 = memref.load %arg6[%c0_26] : memref<1xf32, #tpu.memory_space<smem>>
      memref.store %72, %arg6[%c0_26] : memref<1xf32, #tpu.memory_space<smem>>
    } else {
    }
    return
  }
  func.func @transform_0(%arg0: i32, %arg1: memref<2xi32, #tpu.memory_space<smem>>) -> (i32, i32) {
    %c0_i32 = arith.constant 0 : i32
    %c0_i32_0 = arith.constant 0 : i32
    return %c0_i32, %arg0 : i32, i32
  }
  func.func @transform_1(%arg0: i32, %arg1: memref<2xi32, #tpu.memory_space<smem>>) -> (i32, i32) {
    %c0_i32 = arith.constant 0 : i32
    %c0_i32_0 = arith.constant 0 : i32
    return %c0_i32, %arg0 : i32, i32
  }
  func.func @transform_2(%arg0: i32, %arg1: memref<2xi32, #tpu.memory_space<smem>>) -> (i32, i32) {
    %c0_i32 = arith.constant 0 : i32
    %c0_i32_0 = arith.constant 0 : i32
    return %c0_i32, %arg0 : i32, i32
  }
  func.func @transform_3(%arg0: i32, %arg1: memref<2xi32, #tpu.memory_space<smem>>) -> (i32, i32) {
    %c0_i32 = arith.constant 0 : i32
    %c0_i32_0 = arith.constant 0 : i32
    return %c0_i32, %arg0 : i32, i32
  }
  func.func @transform_4(%arg0: i32, %arg1: memref<2xi32, #tpu.memory_space<smem>>) -> i32 {
    %c0_i32 = arith.constant 0 : i32
    %c0_i32_0 = arith.constant 0 : i32
    return %c0_i32 : i32
  }
}

</mosaic_0001>

<bundles_post_ra>
// kernel: gae_forward.9
= control target key start
LH: loop header
LB: loop body
LE: loop exit
PB: predicated region body
PF: predicated region fallthrough
CT: control target
= control target key end

     0   :  { %s681_s0 = inlined_call_operand.vmem [shape: s32[2], index: 0, kind: input, shape index: {}]   ;;  %s682_s1 = inlined_call_operand.vmem [shape: bf16[128,128], index: 1, kind: input, shape index: {}]   ;;  %s683_s2 = inlined_call_operand.vmem [shape: bf16[128,128], index: 2, kind: input, shape index: {}]   ;;  %s684_s3 = inlined_call_operand.vmem [shape: bf16[128,128], index: 3, kind: input, shape index: {}]   ;;  %s685_s4 = inlined_call_operand.vmem [shape: bf16[128,128], index: 4, kind: input, shape index: {}]   ;;  %s686_s5 = inlined_call_operand.hbm [shape: f32[1], index: 5, kind: output, shape index: {}]  }
   0x1   :  { %s10_s20 = sshll.u32 %s681_s0, 4  ;;  %s11_s20 = int_to_ptr.vmem [resolvable:$true] %s10_s20 }
   0x2   :  { %s505_s21 = scalar_lea.vmem %s11_s20, 16  ;;  %p510_p1 = scmp.lt.s32.totalorder %s11_s20, %s11_s20 }
   0x3   :  { %p506_p0 = scmp.ne.s32.totalorder %s11_s20, %s505_s21  ;;  %p511_p2 = scmp.lt.s32.totalorder %s505_s21, %s505_s21 }
   0x5   :  { %p512_p3 = por %p511_p2, %p510_p1 }
   0x7   :  { %p513_p4 = pnand %p512_p3, %p506_p0 }
   0x9   :  { %516 = shalt.err (!%p513_p4)  }
   0xa   :  { %s531_s22 = smov [#allocation4]  }
   0xb   :  { %13 = dma.vmem_to_smem %s11_s20, 16, %s531_s22, [#allocation3] }
   0xc   :  { %527 = dma.done.wait [#allocation3], 16 }
   0xd   :  { %528 = vsyncadd [#allocation3], 4294967280 }
   0xe   :  { %15 = sfence }
   0xf   :  { %v332_v0 = vld [vmem:[%s682_s1] sm:$0xff]   ;;  %v459_v2 = vld [vmem:[%s682_s1 + $0x8] sm:$0xff]   ;;  %v460_v10 = vld [vmem:[%s682_s1 + $0x10] sm:$0xff]  }
  0x10   :  { %v364_v1 = vld [vmem:[%s683_s2] sm:$0xff]   ;;  %v466_v3 = vld [vmem:[%s683_s2 + $0x8] sm:$0xff]   ;;  %v333_v4 = vunpack.c.l.bf16 %v332_v0  ;;  %v334_v5 = vunpack.c.h.bf16 %v332_v0  ;;  %v337_v8 = vunpack.c.l.bf16 %v459_v2  ;;  %v467_v11 = vld [vmem:[%s683_s2 + $0x10] sm:$0xff]   ;;  %v338_v12 = vunpack.c.h.bf16 %v459_v2 }
  0x11   :  { %v365_v6 = vunpack.c.l.bf16 %v364_v1  ;;  %v366_v7 = vunpack.c.h.bf16 %v364_v1  ;;  %v369_v9 = vunpack.c.l.bf16 %v466_v3  ;;  %v370_v13 = vunpack.c.h.bf16 %v466_v3 }
  0x13   :  { %v97_v14 = vmul.f32 %v365_v6, %v333_v4  ;;  %v98_v15 = vmul.f32 %v366_v7, %v334_v5 }
  0x14   :  { %16 = vsyncpa [#allocation6], 0  ;;  %v341_v16 = vunpack.c.l.bf16 %v460_v10  ;;  %v461_v17 = vld [vmem:[%s682_s1 + $0x18] sm:$0xff]   ;;  %v373_v18 = vunpack.c.l.bf16 %v467_v11  ;;  %v99_v20 = vmul.f32 %v369_v9, %v337_v8  ;;  %v342_v21 = vunpack.c.h.bf16 %v460_v10  ;;  %v462_v27 = vld [vmem:[%s682_s1 + $0x20] sm:$0xff]   ;;  %s517_s16 = scalar_lea.hbm %s686_s5, 16 }
  0x15   :  { %v468_v19 = vld [vmem:[%s683_s2 + $0x18] sm:$0xff]   ;;  %v374_v22 = vunpack.c.h.bf16 %v467_v11  ;;  %v100_v23 = vmul.f32 %v370_v13, %v338_v12  ;;  %v113_v24 = vadd.f32 %v98_v15, %v97_v14  ;;  %v345_v25 = vunpack.c.l.bf16 %v461_v17  ;;  %v469_v28 = vld [vmem:[%s683_s2 + $0x20] sm:$0xff]   ;;  %v473_v41 = vld [vmem:[%s684_s3 + $0x8] sm:$0xff]   ;;  %p518_p6 = scmp.ne.s32.totalorder %s686_s5, %s517_s16  ;;  %p521_p7 = scmp.lt.u32.totalorder %s517_s16, %s686_s5 }
  0x16   :  { %v377_v26 = vunpack.c.l.bf16 %v468_v19  ;;  %v101_v29 = vmul.f32 %v373_v18, %v341_v16  ;;  %v396_v31 = vld [vmem:[%s684_s3] sm:$0xff]   ;;  %v346_v33 = vunpack.c.h.bf16 %v461_v17  ;;  %v378_v34 = vunpack.c.h.bf16 %v468_v19  ;;  %v480_v42 = vld [vmem:[%s685_s4 + $0x8] sm:$0xff]   ;;  %v474_v59 = vld [vmem:[%s684_s3 + $0x10] sm:$0xff]  }
  0x17   :  { %v114_v30 = vadd.f32 %v113_v24, %v99_v20  ;;  %v428_v32 = vld [vmem:[%s685_s4] sm:$0xff]   ;;  %v102_v35 = vmul.f32 %v374_v22, %v342_v21  ;;  %v349_v37 = vunpack.c.l.bf16 %v462_v27  ;;  %v381_v38 = vunpack.c.l.bf16 %v469_v28  ;;  %v463_v43 = vld [vmem:[%s682_s1 + $0x28] sm:$0xff]   ;;  %v481_v60 = vld [vmem:[%s685_s4 + $0x10] sm:$0xff]   ;;  %p523_p8 = pnand %p521_p7, %p518_p6 }
  0x18   :  { %v103_v39 = vmul.f32 %v377_v26, %v345_v25  ;;  %v397_v40 = vunpack.c.l.bf16 %v396_v31  ;;  %v470_v44 = vld [vmem:[%s683_s2 + $0x28] sm:$0xff]   ;;  %v398_v46 = vunpack.c.h.bf16 %v396_v31  ;;  %v429_v47 = vunpack.c.l.bf16 %v428_v32  ;;  %v464_v61 = vld [vmem:[%s682_s1 + $0x30] sm:$0xff]   ;;  %v475_v8 = vld [vmem:[%s684_s3 + $0x18] sm:$0xff]  }
  0x19   :  { %v115_v36 = vadd.f32 %v114_v30, %v100_v23  ;;  %v430_v48 = vunpack.c.h.bf16 %v428_v32  ;;  %v350_v49 = vunpack.c.h.bf16 %v462_v27  ;;  %v382_v50 = vunpack.c.h.bf16 %v469_v28  ;;  %v471_v62 = vld [vmem:[%s683_s2 + $0x30] sm:$0xff]   ;;  %v482_v15 = vld [vmem:[%s685_s4 + $0x18] sm:$0xff]   ;;  %v476_v27 = vld [vmem:[%s684_s3 + $0x20] sm:$0xff]  }
  0x1a   :  { %v104_v51 = vmul.f32 %v378_v34, %v346_v33  ;;  %v401_v53 = vunpack.c.l.bf16 %v473_v41  ;;  %v433_v54 = vunpack.c.l.bf16 %v480_v42  ;;  %v353_v55 = vunpack.c.l.bf16 %v463_v43  ;;  %v465_v16 = vld [vmem:[%s682_s1 + $0x38] sm:$0xff]  }
  0x1b   :  { %v116_v45 = vadd.f32 %v115_v36, %v101_v29  ;;  %v385_v56 = vunpack.c.l.bf16 %v470_v44  ;;  %v105_v57 = vmul.f32 %v381_v38, %v349_v37  ;;  %v402_v58 = vunpack.c.h.bf16 %v473_v41  ;;  %v472_v17 = vld [vmem:[%s683_s2 + $0x38] sm:$0xff]  }
  0x1c   :  { %v434_v0 = vunpack.c.h.bf16 %v480_v42  ;;  %v198_v1 = vmul.f32 %v429_v47, %v397_v40  ;;  %v199_v2 = vmul.f32 %v430_v48, %v398_v46  ;;  %v354_v3 = vunpack.c.h.bf16 %v463_v43 }
  0x1d   :  { %v117_v52 = vadd.f32 %v116_v45, %v102_v35  ;;  %v386_v4 = vunpack.c.h.bf16 %v470_v44  ;;  %v106_v5 = vmul.f32 %v382_v50, %v350_v49  ;;  %v405_v7 = vunpack.c.l.bf16 %v474_v59  ;;  %v483_v35 = vld [vmem:[%s685_s4 + $0x20] sm:$0xff]   ;;  %v477_v45 = vld [vmem:[%s684_s3 + $0x28] sm:$0xff]  }
  0x1e   :  { %v437_v9 = vunpack.c.l.bf16 %v481_v60  ;;  %v200_v10 = vmul.f32 %v433_v54, %v401_v53  ;;  %v357_v11 = vunpack.c.l.bf16 %v464_v61  ;;  %v389_v12 = vunpack.c.l.bf16 %v471_v62 }
  0x1f   :  { %v118_v63 = vadd.f32 %v117_v52, %v103_v39  ;;  %v107_v13 = vmul.f32 %v385_v56, %v353_v55  ;;  %v406_v14 = vunpack.c.h.bf16 %v474_v59  ;;  %v438_v19 = vunpack.c.h.bf16 %v481_v60  ;;  %v478_v59 = vld [vmem:[%s684_s3 + $0x30] sm:$0xff]  }
  0x20   :  { %v201_v20 = vmul.f32 %v434_v0, %v402_v58  ;;  %v214_v21 = vadd.f32 %v199_v2, %v198_v1  ;;  %v358_v22 = vunpack.c.h.bf16 %v464_v61  ;;  %v390_v23 = vunpack.c.h.bf16 %v471_v62  ;;  %v485_v0 = vld [vmem:[%s685_s4 + $0x30] sm:$0xff]  }
  0x21   :  { %v119_v6 = vadd.f32 %v118_v63, %v104_v51  ;;  %v108_v24 = vmul.f32 %v386_v4, %v354_v3  ;;  %v409_v25 = vunpack.c.l.bf16 %v475_v8  ;;  %v441_v28 = vunpack.c.l.bf16 %v482_v15  ;;  %v484_v51 = vld [vmem:[%s685_s4 + $0x28] sm:$0xff]  }
  0x22   :  { %v202_v29 = vmul.f32 %v437_v9, %v405_v7  ;;  %v215_v30 = vadd.f32 %v214_v21, %v200_v10  ;;  %v361_v31 = vunpack.c.l.bf16 %v465_v16  ;;  %v393_v32 = vunpack.c.l.bf16 %v472_v17  ;;  %v479_v7 = vld [vmem:[%s684_s3 + $0x38] sm:$0xff]   ;;  %s662_s3 = sld [smem:[#allocation4]] }
  0x23   :  { %v120_v18 = vadd.f32 %v119_v6, %v105_v57  ;;  %v109_v33 = vmul.f32 %v389_v12, %v357_v11  ;;  %v410_v34 = vunpack.c.h.bf16 %v475_v8  ;;  %v442_v37 = vunpack.c.h.bf16 %v482_v15  ;;  %v486_v12 = vld [vmem:[%s685_s4 + $0x38] sm:$0xff]   ;;  %s330_s4 = sld [smem:[#allocation4 + $0x1]] }
  0x24   :  { %v203_v38 = vmul.f32 %v438_v19, %v406_v14  ;;  %v216_v39 = vadd.f32 %v215_v30, %v201_v20  ;;  %v362_v40 = vunpack.c.h.bf16 %v465_v16  ;;  %v394_v41 = vunpack.c.h.bf16 %v472_v17 }
  0x25   :  { %v121_v26 = vadd.f32 %v120_v18, %v106_v5  ;;  %v110_v42 = vmul.f32 %v390_v23, %v358_v22  ;;  %v413_v43 = vunpack.c.l.bf16 %v476_v27  ;;  %v445_v46 = vunpack.c.l.bf16 %v483_v35 }
  0x26   :  { %v204_v47 = vmul.f32 %v441_v28, %v409_v25  ;;  %v217_v48 = vadd.f32 %v216_v39, %v202_v29  ;;  %v111_v49 = vmul.f32 %v393_v32, %v361_v31  ;;  %v414_v50 = vunpack.c.h.bf16 %v476_v27 }
  0x27   :  { %v122_v36 = vadd.f32 %v121_v26, %v107_v13  ;;  %v446_v53 = vunpack.c.h.bf16 %v483_v35  ;;  %v205_v54 = vmul.f32 %v442_v37, %v410_v34  ;;  %v112_v56 = vmul.f32 %v394_v41, %v362_v40 }
  0x28   :  { %v218_v55 = vadd.f32 %v217_v48, %v203_v38  ;;  %v417_v57 = vunpack.c.l.bf16 %v477_v45  ;;  %v449_v60 = vunpack.c.l.bf16 %v484_v51  ;;  %v206_v61 = vmul.f32 %v445_v46, %v413_v43  ;;  %p307_p5 = scmp.gt.s32.totalorder %s662_s3, 1 }
  0x29   :  { %v123_v44 = vadd.f32 %v122_v36, %v108_v24  ;;  %v418_v63 = vunpack.c.h.bf16 %v477_v45  ;;  %v450_v2 = vunpack.c.h.bf16 %v484_v51  ;;  %v207_v3 = vmul.f32 %v446_v53, %v414_v50 }
  0x2a   :  { %v219_v62 = vadd.f32 %v218_v55, %v204_v47  ;;  %v421_v5 = vunpack.c.l.bf16 %v478_v59  ;;  %v453_v8 = vunpack.c.l.bf16 %v485_v0  ;;  %v208_v9 = vmul.f32 %v449_v60, %v417_v57 }
  0x2b   :  { %v124_v52 = vadd.f32 %v123_v44, %v109_v33  ;;  %v422_v11 = vunpack.c.h.bf16 %v478_v59  ;;  %v454_v14 = vunpack.c.h.bf16 %v485_v0  ;;  %v209_v15 = vmul.f32 %v450_v2, %v418_v63 }
  0x2c   :  { %v220_v4 = vadd.f32 %v219_v62, %v205_v54  ;;  %v425_v17 = vunpack.c.l.bf16 %v479_v7  ;;  %v457_v19 = vunpack.c.l.bf16 %v486_v12  ;;  %v210_v20 = vmul.f32 %v453_v8, %v421_v5 }
  0x2d   :  { %v125_v58 = vadd.f32 %v124_v52, %v110_v42  ;;  %v426_v22 = vunpack.c.h.bf16 %v479_v7  ;;  %v458_v24 = vunpack.c.h.bf16 %v486_v12  ;;  %v211_v25 = vmul.f32 %v454_v14, %v422_v11 }
  0x2e   :  { %v221_v10 = vadd.f32 %v220_v4, %v206_v61  ;;  %v212_v28 = vmul.f32 %v457_v19, %v425_v17  ;;  %v235_v52 = vlaneseq  ;;  %vm278_vm2 = vcmask 1040384  }
  0x2f   :  { %v126_v1 = vadd.f32 %v125_v58, %v111_v49  ;;  %v213_v31 = vmul.f32 %v458_v24, %v426_v22  ;;  %v240_v58 = vstv %s662_s3  ;;  %v258_v8 = vstv %s330_s4  ;;  %s688_s3 = smov (!%p307_p5, %s662_s3), 1 }
  0x30   :  { %v222_v16 = vadd.f32 %v221_v10, %v207_v3  ;;  %v236_v55 = vand.u32 127, %v235_v52  ;;  %s309_s7 = scvt.s32.f32 %s688_s3 }
  0x31   :  { %v127_v6 = vadd.f32 %v126_v1, %v112_v56 }
  0x32   :  { %v223_v21 = vadd.f32 %v222_v16, %v208_v9  ;;  %vm241_vm1 = vcmp.lt.s32.totalorder %v236_v55, %v240_v58  ;;  %vm259_vm4 = vcmp.lt.s32.totalorder %v236_v55, %v258_v8  ;;  %v311_v22 = vstv %s309_s7 }
  0x33   :  { %v128_v13 = vrot.slane %v127_v6, 4 }
  0x34   :  { %v224_v26 = vadd.f32 %v223_v21, %v209_v15 }
  0x35   :  { %v129_v18 = vadd.f32 %v128_v13, %v127_v6 }
  0x36   :  { %v225_v29 = vadd.f32 %v224_v26, %v210_v20 }
  0x37   :  { %v130_v23 = vrot.slane %v129_v18, 2 }
  0x38   :  { %v226_v32 = vadd.f32 %v225_v29, %v211_v25 }
  0x39   :  { %v131_v27 = vadd.f32 %v130_v23, %v129_v18 }
  0x3a   :  { %v227_v34 = vadd.f32 %v226_v32, %v212_v28 }
  0x3b   :  { %v132_v30 = vrot.slane %v131_v27, 1 }
  0x3c   :  { %v228_v36 = vadd.f32 %v227_v34, %v213_v31 }
  0x3d   :  { %v133_v33 = vadd.f32 %v132_v30, %v131_v27 }
  0x3e   :  { %v229_v38 = vrot.slane %v228_v36, 4 }
  0x3f   :  { %v243_v35 = vand.u32 2147483647, %v133_v33  ;;  %v242_v59 = vmin.f32 %v133_v33, 0.0 }
  0x40   :  { %v230_v40 = vadd.f32 %v229_v38, %v228_v36 }
  0x41   :  { %v244_v37 = vsub.f32 0.0, %v243_v35 }
  0x42   :  { %v231_v41 = vrot.slane %v230_v40, 2 }
  0x43   :  { %v245_v39 = vmul.f32 1.442695, %v244_v37 }
  0x44   :  { %v232_v42 = vadd.f32 %v231_v41, %v230_v40 }
  0x45   :  { %495 = vpow2.f32 %v245_v39 }
  0x46   :  { %v233_v43 = vrot.slane %v232_v42, 1 }
  0x48   :  { %v234_v44 = vadd.f32 %v233_v43, %v232_v42 }
  0x4a   :  { %v260_v45 = vsub.f32 0.0, %v234_v44 }
  0x4c   :  { %v262_v47 = vand.u32 2147483647, %v260_v45  ;;  %v261_v9 = vmin.f32 %v260_v45, 0.0 }
  0x4e   :  { %v263_v49 = vsub.f32 0.0, %v262_v47 }
  0x4f   :  { %v496_v46 = vpop.eup %495 }
  0x50   :  { %v247_v48 = vadd.f32 1.0, %v496_v46  ;;  %v250_v50 = vmul.f32 -0.5, %v496_v46  ;;  %v264_v51 = vmul.f32 1.442695, %v263_v49  ;;  %v253_v54 = vand.u32 2147483647, %v496_v46 }
  0x52   :  { %497 = vlog2.f32 %v247_v48  ;;  %v251_v53 = vadd.f32 1.0, %v250_v50  ;;  %vm254_vm0 = vcmp.lt.f32.partialorder %v253_v54, 0.0004427343 }
  0x53   :  { %499 = vpow2.f32 %v264_v51 }
  0x54   :  { %v252_v56 = vmul.f32 %v496_v46, %v251_v53 }
  0x5c   :  { %v498_v57 = vpop.eup %497 }
  0x5d   :  { %v249_v60 = vmul.f32 0.6931472, %v498_v57  ;;  %v500_v61 = vpop.eup %499 }
  0x5e   :  { %v266_v0 = vadd.f32 1.0, %v500_v61  ;;  %v269_v3 = vmul.f32 -0.5, %v500_v61  ;;  %v272_v5 = vand.u32 2147483647, %v500_v61 }
  0x5f   :  { %v255_v62 = vsel %vm254_vm0, %v252_v56, %v249_v60 }
  0x60   :  { %v256_v63 = vsub.f32 %v242_v59, %v255_v62  ;;  %501 = vlog2.f32 %v266_v0  ;;  %v270_v4 = vadd.f32 1.0, %v269_v3  ;;  %vm273_vm3 = vcmp.lt.f32.partialorder %v272_v5, 0.0004427343 }
  0x61   :  { %503 = vrcp.f32 %v311_v22 }
  0x62   :  { %v257_v1 = vsel %vm241_vm1, %v256_v63, 0.0  ;;  %v271_v6 = vmul.f32 %v500_v61, %v270_v4 }
  0x63   :  { %v279_v2 = vsel %vm278_vm2, %v257_v1, 0.0 }
  0x64   :  { %280 = vadd.xlane.f32.xlu0 %v279_v2 }
  0x6a   :  { %v502_v7 = vpop.eup %501 }
  0x6b   :  { %v268_v10 = vmul.f32 0.6931472, %v502_v7  ;;  %v504_v29 = vpop.eup %503 }
  0x6d   :  { %v274_v11 = vsel %vm273_vm3, %v271_v6, %v268_v10 }
  0x6e   :  { %v275_v12 = vsub.f32 %v261_v9, %v274_v11 }
  0x70   :  { %v276_v13 = vsel %vm259_vm4, %v275_v12, 0.0 }
  0x71   :  { %v290_v14 = vsel %vm278_vm2, %v276_v13, 0.0 }
  0x72   :  { %291 = vadd.xlane.f32.xlu0 %v290_v14 }
  0xf1   :  { %v281_v15 = vpop.xlane.xlu0 %280 }
  0xf2   :  { %v282_v16 = vrot.slane %v281_v15, 4 }
  0xf4   :  { %v283_v17 = vadd.f32 %v282_v16, %v281_v15 }
  0xf6   :  { %v284_v18 = vrot.slane %v283_v17, 2 }
  0xf8   :  { %v285_v19 = vadd.f32 %v284_v18, %v283_v17 }
  0xfa   :  { %v286_v20 = vrot.slane %v285_v19, 1 }
  0xfc   :  { %v287_v21 = vadd.f32 %v286_v20, %v285_v19 }
  0xfe   :  { %487 = vpush %v287_v21 }
  0xff   :  { %v292_v23 = vpop.xlane.xlu0 %291 }
 0x100   :  { %v293_v24 = vrot.slane %v292_v23, 4 }
 0x102   :  { %v294_v25 = vadd.f32 %v293_v24, %v292_v23 }
 0x104   :  { %v295_v26 = vrot.slane %v294_v25, 2 }
 0x106   :  { %v296_v27 = vadd.f32 %v295_v26, %v294_v25 }
 0x108   :  { %v297_v28 = vrot.slane %v296_v27, 1 }
 0x10a   :  { %v298_v30 = vadd.f32 %v297_v28, %v296_v27 }
 0x10c   :  { %489 = vpush %v298_v30 }
 0x10d   :  { %491 = vpush %v504_v29 }
 0x12f   :  { %s488_s8 = spop %487 }
 0x130   :  { %s289_s9 = ssub.f32 0.0, %s488_s8 }
 0x13d   :  { %s490_s10 = spop %489 }
 0x13e   :  { %s300_s11 = ssub.f32 %s289_s9, %s490_s10  ;;  %s492_s12 = spop %491 }
 0x140   :  { %s314_s13 = smul.f32 %s492_s12, %s300_s11 }
 0x142   :  { %316 = sst [smem:[#allocation5]] %s314_s13 }
 0x143   :  { %526 = shalt.err (!%p523_p8)
}
 0x144   :  { %s532_s1 = smov [#allocation5]  }
 0x145   :  { %324 = dma.smem_to_hbm %s532_s1, 16, %s686_s5, [#allocation6]  }
 0x146   :  { %529 = dma.done.wait [#allocation6], 16  }
 0x147   :  { %530 = vsyncadd [#allocation6], 4294967280 }
 0x148   :  { %328 = sfence }
 0x149   :  { %329 = vsyncpa [#allocation6], 1 }

// kernel: gae_forward.6
= control target key start
LH: loop header
LB: loop body
LE: loop exit
PB: predicated region body
PF: predicated region fallthrough
CT: control target
= control target key end

     0   :  { %s686_s1 = inlined_call_operand.vmem [shape: bf16[128,128], index: 1, kind: input, shape index: {}]   ;;  %s687_s0 = inlined_call_operand.vmem [shape: bf16[128,128], index: 0, kind: input, shape index: {}]   ;;  %s688_s2 = inlined_call_operand.vmem [shape: bf16[128,128], index: 2, kind: output, shape index: {}]  }
   0x1   :  { %v583_v0 = vld [vmem:[%s686_s1] sm:$0xff]   ;;  %v584_v1 = vld [vmem:[%s686_s1 + $0x8] sm:$0xff]   ;;  %v585_v2 = vld [vmem:[%s686_s1 + $0x10] sm:$0xff]  }
   0x2   :  { %535 = vmatprep.subr.bf16.mxu0 %v583_v0  ;;  %567 = vmatprep.subr.bf16.mxu1 %v583_v0  ;;  %v586_v3 = vld [vmem:[%s686_s1 + $0x18] sm:$0xff]   ;;  %v591_v4 = vld [vmem:[%s687_s0] sm:$0xff]   ;;  %v588_v7 = vld [vmem:[%s686_s1 + $0x28] sm:$0xff]  }
   0x3   :  { %536 = vmatpush3.bf16.msra.mxu0 %v583_v0  ;;  %575 = vmatpush3.bf16.msra.mxu1 %v583_v0  ;;  %v592_v5 = vld [vmem:[%s687_s0 + $0x20] sm:$0xff]   ;;  %v589_v8 = vld [vmem:[%s686_s1 + $0x30] sm:$0xff]   ;;  %v590_v9 = vld [vmem:[%s686_s1 + $0x38] sm:$0xff]  }
   0x4   :  { %537 = vmatprep.subr.bf16.mxu0 %v584_v1  ;;  %568 = vmatprep.subr.bf16.mxu1 %v584_v1  ;;  %v587_v6 = vld [vmem:[%s686_s1 + $0x20] sm:$0xff]   ;;  %v593_v10 = vld [vmem:[%s687_s0 + $0x8] sm:$0xff]   ;;  %v595_v12 = vld [vmem:[%s687_s0 + $0x10] sm:$0xff]  }
   0x5   :  { %551 = vmatprep.mubr.bf16.mxu0 %v591_v4  ;;  %559 = vmatprep.mubr.bf16.mxu1 %v592_v5  ;;  %v594_v11 = vld [vmem:[%s687_s0 + $0x28] sm:$0xff]   ;;  %v596_v13 = vld [vmem:[%s687_s0 + $0x30] sm:$0xff]   ;;  %v597_v14 = vld [vmem:[%s687_s0 + $0x18] sm:$0xff]  }
   0x6   :  { %v598_v15 = vld [vmem:[%s687_s0 + $0x38] sm:$0xff]  }
   0x7   :  { %538 = vmatpush3.bf16.msra.mxu0 %v584_v1  ;;  %576 = vmatpush3.bf16.msra.mxu1 %v584_v1 }
   0x8   :  { %539 = vmatprep.subr.bf16.mxu0 %v585_v2  ;;  %569 = vmatprep.subr.bf16.mxu1 %v585_v2 }
   0xb   :  { %540 = vmatpush3.bf16.msra.mxu0 %v585_v2  ;;  %577 = vmatpush3.bf16.msra.mxu1 %v585_v2 }
   0xc   :  { %541 = vmatprep.subr.bf16.mxu0 %v586_v3  ;;  %570 = vmatprep.subr.bf16.mxu1 %v586_v3 }
   0xf   :  { %542 = vmatpush3.bf16.msra.mxu0 %v586_v3  ;;  %578 = vmatpush3.bf16.msra.mxu1 %v586_v3 }
  0x10   :  { %543 = vmatprep.subr.bf16.mxu0 %v587_v6  ;;  %571 = vmatprep.subr.bf16.mxu1 %v587_v6 }
  0x13   :  { %544 = vmatpush3.bf16.msra.mxu0 %v587_v6  ;;  %579 = vmatpush3.bf16.msra.mxu1 %v587_v6 }
  0x14   :  { %545 = vmatprep.subr.bf16.mxu0 %v588_v7  ;;  %572 = vmatprep.subr.bf16.mxu1 %v588_v7 }
  0x17   :  { %546 = vmatpush3.bf16.msra.mxu0 %v588_v7  ;;  %580 = vmatpush3.bf16.msra.mxu1 %v588_v7 }
  0x18   :  { %547 = vmatprep.subr.bf16.mxu0 %v589_v8  ;;  %573 = vmatprep.subr.bf16.mxu1 %v589_v8 }
  0x1b   :  { %548 = vmatpush3.bf16.msra.mxu0 %v589_v8  ;;  %581 = vmatpush3.bf16.msra.mxu1 %v589_v8 }
  0x1c   :  { %549 = vmatprep.subr.bf16.mxu0 %v590_v9  ;;  %574 = vmatprep.subr.bf16.mxu1 %v590_v9 }
  0x1f   :  { %550 = vmatpush3.bf16.msra.mxu0 %v590_v9  ;;  %582 = vmatpush3.bf16.msra.mxu1 %v590_v9 }
  0x22   :  { %552 = vmatmul.mubr.bf16.vlgmr.msra.gmra.mrb[0].mxu0 %v593_v10  ;;  %560 = vmatmul.mubr.bf16.vlgmr.msra.gmra.mrb[0].mxu1 %v594_v11 }
  0x23   :  { %555 = vmatprep.mubr.bf16.mxu0 %v595_v12  ;;  %563 = vmatprep.mubr.bf16.mxu1 %v596_v13 }
  0x2a   :  { %556 = vmatmul.mubr.bf16.gmra.mrb[4].mxu0 %v597_v14  ;;  %564 = vmatmul.mubr.bf16.gmra.mrb[4].mxu1 %v598_v15 }
  0xf5   :  { %v553_v16 = vpop.f32.mrb[0].mxu0  ;;  %v561_v17 = vpop.f32.mrb[0].mxu1 }
  0xf6   :  { %v210_v18 = vpop.f32.mrb[1].mxu0  ;;  %v242_v19 = vpop.f32.mrb[1].mxu1  ;;  %v326_v22 = vmax.f32 %v553_v16, 0.0  ;;  %v334_v23 = vmax.f32 %v561_v17, 0.0 }
  0xf7   :  { %v554_v20 = vpop.f32.mrb[2].mxu0  ;;  %v562_v21 = vpop.f32.mrb[2].mxu1  ;;  %v324_v28 = vmax.f32 %v210_v18, 0.0  ;;  %v332_v29 = vmax.f32 %v242_v19, 0.0 }
  0xf8   :  { %v327_v24 = vmax.f32 %v554_v20, 0.0  ;;  %v335_v25 = vmax.f32 %v562_v21, 0.0  ;;  %v213_v26 = vpop.f32.mrb[3].mxu0  ;;  %v245_v27 = vpop.f32.mrb[3].mxu1 }
  0xf9   :  { %v325_v30 = vmax.f32 %v213_v26, 0.0  ;;  %v333_v31 = vmax.f32 %v245_v27, 0.0 }
  0xfa   :  { %v480_v32 = vpack.c.bf16 %v327_v24, %v326_v22  ;;  %v500_v33 = vpack.c.bf16 %v335_v25, %v334_v23 }
  0xfb   :  { %v475_v34 = vpack.c.bf16 %v325_v30, %v324_v28  ;;  %v495_v35 = vpack.c.bf16 %v333_v31, %v332_v29 }
  0xfc   :  { %512 = vst [vmem:[%s688_s2 + $0x8] sm:$0xff] %v480_v32   ;;  %516 = vst [vmem:[%s688_s2 + $0x28] sm:$0xff] %v500_v33  }
  0xfd   :  { %476 = vst [vmem:[%s688_s2] sm:$0xff] %v475_v34   ;;  %515 = vst [vmem:[%s688_s2 + $0x20] sm:$0xff] %v495_v35   ;;  %v557_v36 = vpop.f32.mrb[4].mxu0  ;;  %v565_v37 = vpop.f32.mrb[4].mxu1 }
  0xfe   :  { %v226_v38 = vpop.f32.mrb[5].mxu0  ;;  %v258_v39 = vpop.f32.mrb[5].mxu1  ;;  %v330_v42 = vmax.f32 %v557_v36, 0.0  ;;  %v338_v43 = vmax.f32 %v565_v37, 0.0 }
  0xff   :  { %v558_v40 = vpop.f32.mrb[6].mxu0  ;;  %v566_v41 = vpop.f32.mrb[6].mxu1  ;;  %v328_v48 = vmax.f32 %v226_v38, 0.0  ;;  %v336_v49 = vmax.f32 %v258_v39, 0.0 }
 0x100   :  { %v331_v44 = vmax.f32 %v558_v40, 0.0  ;;  %v339_v45 = vmax.f32 %v566_v41, 0.0  ;;  %v229_v46 = vpop.f32.mrb[7].mxu0  ;;  %v261_v47 = vpop.f32.mrb[7].mxu1 }
 0x101   :  { %v329_v50 = vmax.f32 %v229_v46, 0.0  ;;  %v337_v51 = vmax.f32 %v261_v47, 0.0 }
 0x102   :  { %v490_v52 = vpack.c.bf16 %v331_v44, %v330_v42  ;;  %v510_v53 = vpack.c.bf16 %v339_v45, %v338_v43 }
 0x103   :  { %v485_v54 = vpack.c.bf16 %v329_v50, %v328_v48  ;;  %v505_v55 = vpack.c.bf16 %v337_v51, %v336_v49 }
 0x104   :  { %514 = vst [vmem:[%s688_s2 + $0x18] sm:$0xff] %v490_v52   ;;  %518 = vst [vmem:[%s688_s2 + $0x38] sm:$0xff] %v510_v53  }
 0x105   :  { %513 = vst [vmem:[%s688_s2 + $0x10] sm:$0xff] %v485_v54   ;;  %517 = vst [vmem:[%s688_s2 + $0x30] sm:$0xff] %v505_v55  }

// kernel: gae_forward.5
= control target key start
LH: loop header
LB: loop body
LE: loop exit
PB: predicated region body
PF: predicated region fallthrough
CT: control target
= control target key end

     0   :  { %s670_s1 = inlined_call_operand.vmem [shape: bf16[128,128], index: 1, kind: input, shape index: {}]   ;;  %s671_s0 = inlined_call_operand.vmem [shape: bf16[128,128], index: 0, kind: input, shape index: {}]   ;;  %s672_s2 = inlined_call_operand.vmem [shape: bf16[128,128], index: 2, kind: output, shape index: {}]  }
   0x1   :  { %v567_v0 = vld [vmem:[%s670_s1] sm:$0xff]   ;;  %v568_v1 = vld [vmem:[%s670_s1 + $0x8] sm:$0xff]   ;;  %v569_v2 = vld [vmem:[%s670_s1 + $0x10] sm:$0xff]  }
   0x2   :  { %519 = vmatprep.subr.bf16.mxu0 %v567_v0  ;;  %551 = vmatprep.subr.bf16.mxu1 %v567_v0  ;;  %v570_v3 = vld [vmem:[%s670_s1 + $0x18] sm:$0xff]   ;;  %v575_v4 = vld [vmem:[%s671_s0] sm:$0xff]   ;;  %v572_v7 = vld [vmem:[%s670_s1 + $0x28] sm:$0xff]  }
   0x3   :  { %520 = vmatpush3.bf16.msra.mxu0 %v567_v0  ;;  %559 = vmatpush3.bf16.msra.mxu1 %v567_v0  ;;  %v576_v5 = vld [vmem:[%s671_s0 + $0x20] sm:$0xff]   ;;  %v573_v8 = vld [vmem:[%s670_s1 + $0x30] sm:$0xff]   ;;  %v574_v9 = vld [vmem:[%s670_s1 + $0x38] sm:$0xff]  }
   0x4   :  { %521 = vmatprep.subr.bf16.mxu0 %v568_v1  ;;  %552 = vmatprep.subr.bf16.mxu1 %v568_v1  ;;  %v571_v6 = vld [vmem:[%s670_s1 + $0x20] sm:$0xff]   ;;  %v577_v10 = vld [vmem:[%s671_s0 + $0x8] sm:$0xff]   ;;  %v579_v12 = vld [vmem:[%s671_s0 + $0x10] sm:$0xff]  }
   0x5   :  { %535 = vmatprep.mubr.bf16.mxu0 %v575_v4  ;;  %543 = vmatprep.mubr.bf16.mxu1 %v576_v5  ;;  %v578_v11 = vld [vmem:[%s671_s0 + $0x28] sm:$0xff]   ;;  %v580_v13 = vld [vmem:[%s671_s0 + $0x30] sm:$0xff]   ;;  %v581_v14 = vld [vmem:[%s671_s0 + $0x18] sm:$0xff]  }
   0x6   :  { %v582_v15 = vld [vmem:[%s671_s0 + $0x38] sm:$0xff]  }
   0x7   :  { %522 = vmatpush3.bf16.msra.mxu0 %v568_v1  ;;  %560 = vmatpush3.bf16.msra.mxu1 %v568_v1 }
   0x8   :  { %523 = vmatprep.subr.bf16.mxu0 %v569_v2  ;;  %553 = vmatprep.subr.bf16.mxu1 %v569_v2 }
   0xb   :  { %524 = vmatpush3.bf16.msra.mxu0 %v569_v2  ;;  %561 = vmatpush3.bf16.msra.mxu1 %v569_v2 }
   0xc   :  { %525 = vmatprep.subr.bf16.mxu0 %v570_v3  ;;  %554 = vmatprep.subr.bf16.mxu1 %v570_v3 }
   0xf   :  { %526 = vmatpush3.bf16.msra.mxu0 %v570_v3  ;;  %562 = vmatpush3.bf16.msra.mxu1 %v570_v3 }
  0x10   :  { %527 = vmatprep.subr.bf16.mxu0 %v571_v6  ;;  %555 = vmatprep.subr.bf16.mxu1 %v571_v6 }
  0x13   :  { %528 = vmatpush3.bf16.msra.mxu0 %v571_v6  ;;  %563 = vmatpush3.bf16.msra.mxu1 %v571_v6 }
  0x14   :  { %529 = vmatprep.subr.bf16.mxu0 %v572_v7  ;;  %556 = vmatprep.subr.bf16.mxu1 %v572_v7 }
  0x17   :  { %530 = vmatpush3.bf16.msra.mxu0 %v572_v7  ;;  %564 = vmatpush3.bf16.msra.mxu1 %v572_v7 }
  0x18   :  { %531 = vmatprep.subr.bf16.mxu0 %v573_v8  ;;  %557 = vmatprep.subr.bf16.mxu1 %v573_v8 }
  0x1b   :  { %532 = vmatpush3.bf16.msra.mxu0 %v573_v8  ;;  %565 = vmatpush3.bf16.msra.mxu1 %v573_v8 }
  0x1c   :  { %533 = vmatprep.subr.bf16.mxu0 %v574_v9  ;;  %558 = vmatprep.subr.bf16.mxu1 %v574_v9 }
  0x1f   :  { %534 = vmatpush3.bf16.msra.mxu0 %v574_v9  ;;  %566 = vmatpush3.bf16.msra.mxu1 %v574_v9 }
  0x22   :  { %536 = vmatmul.mubr.bf16.vlgmr.msra.gmra.mrb[0].mxu0 %v577_v10  ;;  %544 = vmatmul.mubr.bf16.vlgmr.msra.gmra.mrb[0].mxu1 %v578_v11 }
  0x23   :  { %539 = vmatprep.mubr.bf16.mxu0 %v579_v12  ;;  %547 = vmatprep.mubr.bf16.mxu1 %v580_v13 }
  0x2a   :  { %540 = vmatmul.mubr.bf16.gmra.mrb[4].mxu0 %v581_v14  ;;  %548 = vmatmul.mubr.bf16.gmra.mrb[4].mxu1 %v582_v15 }
  0xf5   :  { %v537_v16 = vpop.f32.mrb[0].mxu0  ;;  %v545_v17 = vpop.f32.mrb[0].mxu1 }
  0xf6   :  { %v210_v18 = vpop.f32.mrb[1].mxu0  ;;  %v242_v19 = vpop.f32.mrb[1].mxu1 }
  0xf7   :  { %v538_v20 = vpop.f32.mrb[2].mxu0  ;;  %v546_v21 = vpop.f32.mrb[2].mxu1 }
  0xf8   :  { %v464_v22 = vpack.c.bf16 %v538_v20, %v537_v16  ;;  %v484_v23 = vpack.c.bf16 %v546_v21, %v545_v17  ;;  %v213_v24 = vpop.f32.mrb[3].mxu0  ;;  %v245_v25 = vpop.f32.mrb[3].mxu1 }
  0xf9   :  { %v459_v26 = vpack.c.bf16 %v213_v24, %v210_v18  ;;  %v479_v27 = vpack.c.bf16 %v245_v25, %v242_v19 }
  0xfa   :  { %496 = vst [vmem:[%s672_s2 + $0x8] sm:$0xff] %v464_v22   ;;  %500 = vst [vmem:[%s672_s2 + $0x28] sm:$0xff] %v484_v23  }
  0xfb   :  { %460 = vst [vmem:[%s672_s2] sm:$0xff] %v459_v26   ;;  %499 = vst [vmem:[%s672_s2 + $0x20] sm:$0xff] %v479_v27  }
  0xfd   :  { %v541_v28 = vpop.f32.mrb[4].mxu0  ;;  %v549_v29 = vpop.f32.mrb[4].mxu1 }
  0xfe   :  { %v226_v30 = vpop.f32.mrb[5].mxu0  ;;  %v258_v31 = vpop.f32.mrb[5].mxu1 }
  0xff   :  { %v542_v32 = vpop.f32.mrb[6].mxu0  ;;  %v550_v33 = vpop.f32.mrb[6].mxu1 }
 0x100   :  { %v474_v34 = vpack.c.bf16 %v542_v32, %v541_v28  ;;  %v494_v35 = vpack.c.bf16 %v550_v33, %v549_v29  ;;  %v229_v36 = vpop.f32.mrb[7].mxu0  ;;  %v261_v37 = vpop.f32.mrb[7].mxu1 }
 0x101   :  { %v469_v38 = vpack.c.bf16 %v229_v36, %v226_v30  ;;  %v489_v39 = vpack.c.bf16 %v261_v37, %v258_v31 }
 0x102   :  { %498 = vst [vmem:[%s672_s2 + $0x18] sm:$0xff] %v474_v34   ;;  %502 = vst [vmem:[%s672_s2 + $0x38] sm:$0xff] %v494_v35  }
 0x103   :  { %497 = vst [vmem:[%s672_s2 + $0x10] sm:$0xff] %v469_v38   ;;  %501 = vst [vmem:[%s672_s2 + $0x30] sm:$0xff] %v489_v39  }

</bundles_post_ra>
